<compile_context>
chip_gen: v7x
topology: tpu7x:2x2x1
jax: 0.10.0
libtpu: 0.0.40
codegen_flags: <defaults>
</compile_context>

<pallas_src>
import jax
import jax.numpy as jnp
from jax import lax
from jax.experimental import pallas as pl
from jax.experimental.pallas import tpu as pltpu


def _round_up(x, m):
    return ((x + m - 1) // m) * m


def _ffn_kernel(x_ref, w1_ref, b1_ref, w2_ref, b2_ref, o_ref, acc_ref):
    k = pl.program_id(1)

    @pl.when(k == 0)
    def _():
        acc_ref[...] = jnp.zeros_like(acc_ref)

    # First linear on this hidden tile: (tm, dim_p)bf16 @ (dim_p, th)bf16 -> f32.
    h = jnp.dot(x_ref[...], w1_ref[...], preferred_element_type=jnp.float32)
    h = h + b1_ref[...]
    # Exact GELU: 0.5 * h * (1 + erf(h / sqrt(2))), in f32.
    h = 0.5 * h * (1.0 + lax.erf(h * 0.7071067811865476))
    # Second linear partial product over this hidden tile, f32 accumulation.
    acc_ref[...] += jnp.dot(h.astype(w2_ref.dtype), w2_ref[...],
                            preferred_element_type=jnp.float32)

    @pl.when(k == pl.num_programs(1) - 1)
    def _():
        o_ref[...] = (acc_ref[...] + b2_ref[...]).astype(o_ref.dtype)


def feed_forward(x, w1, b1, w2, b2, *, tm=256, th=512):
    """x: (B, S, dim); w1: (dim, hidden); b1: (hidden,); w2: (hidden, dim);
    b2: (dim,).  Returns (B, S, dim).  Weights are stored (in, out) so the
    kernel computes x @ W + b (== PyTorch x @ W.T with W of shape (out, in))."""
    B, S, dim = x.shape
    hidden = w1.shape[1]
    rows = B * S

    # Padded / tiled sizes (lane dims -> multiples of 128, row tile -> mult of 16).
    dim_p = _round_up(dim, 128)
    hidden_p = _round_up(hidden, 128)

    tm = _round_up(min(tm, _round_up(rows, 16)), 16)
    rows_p = _round_up(rows, tm)

    th = _round_up(min(th, hidden_p), 128)
    while hidden_p % th != 0:
        th -= 128

    # Zero-padded, bf16 activations/weights; f32 biases (added post-accumulation).
    x2 = jnp.pad(x.reshape(rows, dim), ((0, rows_p - rows), (0, dim_p - dim)))
    x2 = x2.astype(jnp.bfloat16)
    w1_p = jnp.pad(w1, ((0, dim_p - dim), (0, hidden_p - hidden))).astype(jnp.bfloat16)
    w2_p = jnp.pad(w2, ((0, hidden_p - hidden), (0, dim_p - dim))).astype(jnp.bfloat16)
    b1_p = jnp.pad(b1, (0, hidden_p - hidden)).astype(jnp.float32).reshape(1, hidden_p)
    b2_p = jnp.pad(b2, (0, dim_p - dim)).astype(jnp.float32).reshape(1, dim_p)

    grid = (rows_p // tm, hidden_p // th)

    out = pl.pallas_call(
        _ffn_kernel,
        out_shape=jax.ShapeDtypeStruct((rows_p, dim_p), x.dtype),
        grid_spec=pltpu.PrefetchScalarGridSpec(
            num_scalar_prefetch=0,
            grid=grid,
            in_specs=[
                pl.BlockSpec((tm, dim_p), lambda i, k: (i, 0)),     # x tile (reused over k)
                pl.BlockSpec((dim_p, th), lambda i, k: (0, k)),     # W1 hidden slab (streamed)
                pl.BlockSpec((1, th), lambda i, k: (0, k)),         # b1 slab
                pl.BlockSpec((th, dim_p), lambda i, k: (k, 0)),     # W2 hidden slab (streamed)
                pl.BlockSpec((1, dim_p), lambda i, k: (0, 0)),      # b2
            ],
            out_specs=pl.BlockSpec((tm, dim_p), lambda i, k: (i, 0)),
            scratch_shapes=[pltpu.VMEM((tm, dim_p), jnp.float32)],  # f32 accumulator
        ),
        compiler_params=pltpu.CompilerParams(
            dimension_semantics=("parallel", "arbitrary"),
            # Above the 16/32 MiB scoped defaults, below v7x's 64 MiB physical.
            vmem_limit_bytes=48 * 1024 * 1024,
        ),
    )(x2, w1_p, b1_p, w2_p, b2_p)

    return out[:rows, :dim].reshape(B, S, dim)


def _reference(x, w1, b1, w2, b2):
    h = jnp.dot(x, w1) + b1
    h = 0.5 * h * (1.0 + lax.erf(h / jnp.sqrt(2.0)))
    return jnp.dot(h, w2) + b2


if __name__ == "__main__":
    # Small shapes consistent with the module: dim=32, hidden_dim=64.
    B, S, dim, hidden = 2, 64, 32, 64

    key = jax.random.PRNGKey(0)
    kx, kw1, kb1, kw2, kb2 = jax.random.split(key, 5)

    x = jax.random.normal(kx, (B, S, dim), dtype=jnp.float32)

    # Deterministic init mimicking nn.Linear: U(-1/sqrt(fan_in), 1/sqrt(fan_in)).
    lim1 = 1.0 / jnp.sqrt(jnp.float32(dim))
    lim2 = 1.0 / jnp.sqrt(jnp.float32(hidden))
    w1 = jax.random.uniform(kw1, (dim, hidden), jnp.float32, -lim1, lim1)
    b1 = jax.random.uniform(kb1, (hidden,), jnp.float32, -lim1, lim1)
    w2 = jax.random.uniform(kw2, (hidden, dim), jnp.float32, -lim2, lim2)
    b2 = jax.random.uniform(kb2, (dim,), jnp.float32, -lim2, lim2)

    y = feed_forward(x, w1, b1, w2, b2)
    y = jax.block_until_ready(y)

    y_ref = _reference(x, w1, b1, w2, b2)
    assert y.shape == (B, S, dim)
    # bf16 MXU inputs with f32 accumulation: loosened tolerance vs the f32 reference.
    assert jnp.allclose(y, y_ref, atol=2e-2, rtol=2e-2), "mismatch vs reference"

    print("KERNEL_OK")
</pallas_src>

<mosaic_0001>
module attributes {stable_mosaic.version = 11 : i64} {
  func.func @_ffn_kernel(%arg0: i32, %arg1: i32, %arg2: memref<128x128xbf16, #tpu.memory_space<vmem>>, %arg3: memref<128x128xbf16, #tpu.memory_space<vmem>>, %arg4: memref<1x128xf32, #tpu.memory_space<vmem>>, %arg5: memref<128x128xbf16, #tpu.memory_space<vmem>>, %arg6: memref<1x128xf32, #tpu.memory_space<vmem>>, %arg7: memref<128x128xf32, #tpu.memory_space<vmem>>, %arg8: memref<128x128xf32, #tpu.memory_space<vmem>>) attributes {dimension_semantics = [#tpu.dimension_semantics<parallel>, #tpu.dimension_semantics<arbitrary>], iteration_bounds = array<i64: 1, 1>, scalar_prefetch = 0 : i64, scratch_operands = 1 : i64, tpu.core_type = #tpu.core_type<tc>, window_params = [{transform_indices = @transform_0, window_bounds = array<i64: 128, 128>}, {transform_indices = @transform_1, window_bounds = array<i64: 128, 128>}, {transform_indices = @transform_2, window_bounds = array<i64: 1, 128>}, {transform_indices = @transform_3, window_bounds = array<i64: 128, 128>}, {pipeline_mode = #tpu.pipeline_mode<synchronous>, transform_indices = @transform_4, window_bounds = array<i64: 1, 128>}, {transform_indices = @transform_5, window_bounds = array<i64: 128, 128>}]} {
    %c0_i32 = arith.constant 0 : i32
    %0 = arith.cmpi eq, %arg1, %c0_i32 : i32
    %1 = arith.extui %0 : i1 to i32
    %c0_i32_0 = arith.constant 0 : i32
    %2 = arith.cmpi ne, %1, %c0_i32_0 : i32
    scf.if %2 {
      %cst_18 = arith.constant 0.000000e+00 : f32
      %26 = vector.broadcast %cst_18 : f32 to vector<128x128xf32>
      %c0_19 = arith.constant 0 : index
      %c0_20 = arith.constant 0 : index
      %27 = vector.load %arg8[%c0_19, %c0_20] : memref<128x128xf32, #tpu.memory_space<vmem>>, vector<128x128xf32>
      tpu.vector_store %arg8[%c0_19, %c0_20], %26 {strides = array<i32>} : memref<128x128xf32, #tpu.memory_space<vmem>>, vector<128x128xf32>,
    } else {
    }
    %c0 = arith.constant 0 : index
    %c0_1 = arith.constant 0 : index
    %3 = vector.load %arg2[%c0, %c0_1] : memref<128x128xbf16, #tpu.memory_space<vmem>>, vector<128x128xbf16>
    %c0_2 = arith.constant 0 : index
    %c0_3 = arith.constant 0 : index
    %4 = vector.load %arg3[%c0_2, %c0_3] : memref<128x128xbf16, #tpu.memory_space<vmem>>, vector<128x128xbf16>
    %cst = arith.constant dense<0.000000e+00> : vector<128x128xf32>
    %5 = tpu.matmul %3, %4, %cst {dimension_numbers = #tpu.dot_dimension_numbers<[1], [0], [0], [1], [0, 0, 1, 1], [], []>} : vector<128x128xbf16>, vector<128x128xbf16>, vector<128x128xf32> -> vector<128x128xf32>
    %c0_4 = arith.constant 0 : index
    %c0_5 = arith.constant 0 : index
    %6 = vector.load %arg4[%c0_4, %c0_5] : memref<1x128xf32, #tpu.memory_space<vmem>>, vector<1x128xf32>
    %7 = vector.broadcast %6 : vector<1x128xf32> to vector<128x128xf32>
    %8 = arith.addf %5, %7 : vector<128x128xf32>
    %cst_6 = arith.constant 5.000000e-01 : f32
    %9 = vector.broadcast %cst_6 : f32 to vector<128x128xf32>
    %10 = arith.mulf %9, %8 : vector<128x128xf32>
    %cst_7 = arith.constant 0.707106769 : f32
    %11 = vector.broadcast %cst_7 : f32 to vector<128x128xf32>
    %12 = arith.mulf %8, %11 : vector<128x128xf32>
    %13 = math.erf %12 : vector<128x128xf32>
    %cst_8 = arith.constant 1.000000e+00 : f32
    %14 = vector.broadcast %cst_8 : f32 to vector<128x128xf32>
    %15 = arith.addf %14, %13 : vector<128x128xf32>
    %16 = arith.mulf %10, %15 : vector<128x128xf32>
    %c0_9 = arith.constant 0 : index
    %c0_10 = arith.constant 0 : index
    %17 = vector.load %arg8[%c0_9, %c0_10] : memref<128x128xf32, #tpu.memory_space<vmem>>, vector<128x128xf32>
    %18 = arith.truncf %16 : vector<128x128xf32> to vector<128x128xbf16>
    %c0_11 = arith.constant 0 : index
    %c0_12 = arith.constant 0 : index
    %19 = vector.load %arg5[%c0_11, %c0_12] : memref<128x128xbf16, #tpu.memory_space<vmem>>, vector<128x128xbf16>
    %cst_13 = arith.constant dense<0.000000e+00> : vector<128x128xf32>
    %20 = tpu.matmul %18, %19, %cst_13 {dimension_numbers = #tpu.dot_dimension_numbers<[1], [0], [0], [1], [0, 0, 1, 1], [], []>} : vector<128x128xbf16>, vector<128x128xbf16>, vector<128x128xf32> -> vector<128x128xf32>
    %21 = arith.addf %17, %20 : vector<128x128xf32>
    %c0_14 = arith.constant 0 : index
    %c0_15 = arith.constant 0 : index
    %22 = vector.load %arg8[%c0_14, %c0_15] : memref<128x128xf32, #tpu.memory_space<vmem>>, vector<128x128xf32>
    tpu.vector_store %arg8[%c0_14, %c0_15], %21 {strides = array<i32>} : memref<128x128xf32, #tpu.memory_space<vmem>>, vector<128x128xf32>,
    %c0_i32_16 = arith.constant 0 : i32
    %23 = arith.cmpi eq, %arg1, %c0_i32_16 : i32
    %24 = arith.extui %23 : i1 to i32
    %c0_i32_17 = arith.constant 0 : i32
    %25 = arith.cmpi ne, %24, %c0_i32_17 : i32
    scf.if %25 {
      %c0_18 = arith.constant 0 : index
      %c0_19 = arith.constant 0 : index
      %26 = vector.load %arg8[%c0_18, %c0_19] : memref<128x128xf32, #tpu.memory_space<vmem>>, vector<128x128xf32>
      %c0_20 = arith.constant 0 : index
      %c0_21 = arith.constant 0 : index
      %27 = vector.load %arg6[%c0_20, %c0_21] : memref<1x128xf32, #tpu.memory_space<vmem>>, vector<1x128xf32>
      %28 = vector.broadcast %27 : vector<1x128xf32> to vector<128x128xf32>
      %29 = arith.addf %26, %28 : vector<128x128xf32>
      %c0_22 = arith.constant 0 : index
      %c0_23 = arith.constant 0 : index
      %30 = vector.load %arg7[%c0_22, %c0_23] : memref<128x128xf32, #tpu.memory_space<vmem>>, vector<128x128xf32>
      tpu.vector_store %arg7[%c0_22, %c0_23], %29 {strides = array<i32>} : memref<128x128xf32, #tpu.memory_space<vmem>>, vector<128x128xf32>,
    } else {
    }
    return
  }
  func.func @transform_0(%arg0: i32, %arg1: i32) -> (i32, i32) {
    %c0_i32 = arith.constant 0 : i32
    %c0_i32_0 = arith.constant 0 : i32
    return %arg0, %c0_i32 : i32, i32
  }
  func.func @transform_1(%arg0: i32, %arg1: i32) -> (i32, i32) {
    %c0_i32 = arith.constant 0 : i32
    %c0_i32_0 = arith.constant 0 : i32
    return %c0_i32, %arg1 : i32, i32
  }
  func.func @transform_2(%arg0: i32, %arg1: i32) -> (i32, i32) {
    %c0_i32 = arith.constant 0 : i32
    %c0_i32_0 = arith.constant 0 : i32
    return %c0_i32, %arg1 : i32, i32
  }
  func.func @transform_3(%arg0: i32, %arg1: i32) -> (i32, i32) {
    %c0_i32 = arith.constant 0 : i32
    %c0_i32_0 = arith.constant 0 : i32
    return %arg1, %c0_i32 : i32, i32
  }
  func.func @transform_4(%arg0: i32, %arg1: i32) -> (i32, i32) {
    %c0_i32 = arith.constant 0 : i32
    %c0_i32_0 = arith.constant 0 : i32
    %c0_i32_1 = arith.constant 0 : i32
    return %c0_i32, %c0_i32_0 : i32, i32
  }
  func.func @transform_5(%arg0: i32, %arg1: i32) -> (i32, i32) {
    %c0_i32 = arith.constant 0 : i32
    %c0_i32_0 = arith.constant 0 : i32
    return %arg0, %c0_i32 : i32, i32
  }
}

</mosaic_0001>

<bundles_post_ra>
// kernel: tpu_custom_call.1
= control target key start
LH: loop header
LB: loop body
LE: loop exit
PB: predicated region body
PF: predicated region fallthrough
CT: control target
= control target key end

     0   :  { %10 = vsyncpa [#allocation4], 0  ;;  %s1102_s0 = inlined_call_operand.hbm [shape: bf16[128,128], index: 0, kind: input, shape index: {}]   ;;  %s1103_s1 = inlined_call_operand.hbm [shape: bf16[128,128], index: 1, kind: input, shape index: {}]   ;;  %s1104_s2 = inlined_call_operand.vmem [shape: f32[1,128], index: 2, kind: input, shape index: {}]   ;;  %s1105_s3 = inlined_call_operand.hbm [shape: bf16[128,128], index: 3, kind: input, shape index: {}]   ;;  %s1106_s4 = inlined_call_operand.vmem [shape: f32[1,128], index: 4, kind: input, shape index: {}]   ;;  %s1107_s5 = inlined_call_operand.hbm [shape: f32[128,128], index: 5, kind: output, shape index: {}]  }
   0x1   :  { %11 = vsyncpa [#allocation7], 0 }
   0x2   :  { %12 = vsyncpa [#allocation5], 0  ;;  %s968_s18 = smov [#allocation6]   ;;  %s969_s20 = smov [#allocation3]  }
   0x3   :  { %s30_s19 = sshll.u32 %s968_s18, 4  ;;  %s18_s21 = sshll.u32 %s969_s20, 4  ;;  %s31_s19 = int_to_ptr.vmem [resolvable:$true] %s30_s19  ;;  %s1006_s21 = int_to_ptr.vmem [resolvable:$true] %s18_s21 }
   0x4   :  { %s874_s24 = scalar_lea.hbm %s1103_s1, 1024 }
   0x5   :  { %p875_p0 = scmp.ne.s32.totalorder %s1103_s1, %s874_s24  ;;  %p878_p1 = scmp.lt.u32.totalorder %s874_s24, %s1103_s1 }
   0x7   :  { %p880_p2 = pnand %p878_p1, %p875_p0 }
   0x9   :  { %883 = shalt.err (!%p880_p2)
}
   0xa   :  { %s884_s29 = scalar_lea.vmem %s31_s19, 1024  ;;  %p889_p4 = scmp.lt.s32.totalorder %s31_s19, %s31_s19 }
   0xb   :  { %p885_p3 = scmp.ne.s32.totalorder %s31_s19, %s884_s29  ;;  %p890_p5 = scmp.lt.s32.totalorder %s884_s29, %s884_s29 }
   0xd   :  { %p891_p6 = por %p890_p5, %p889_p4 }
   0xf   :  { %p892_p7 = pnand %p891_p6, %p885_p3 }
  0x11   :  { %895 = shalt.err (!%p892_p7)
}
  0x12   :  { %s970_s30 = smov 64   ;;  %s971_s6 = smov 4  }
  0x13   :  { %36 = dma.hbm_to_vmem [thread:$0]  %s1103_s1, 1024, %s31_s19, [#allocation7], %s970_s30, %s970_s30, %s971_s6  }
  0x14   :  { %s896_s11 = scalar_lea.hbm %s1102_s0, 1024 }
  0x15   :  { %p897_p8 = scmp.ne.s32.totalorder %s1102_s0, %s896_s11  ;;  %p900_p9 = scmp.lt.u32.totalorder %s896_s11, %s1102_s0 }
  0x17   :  { %p902_p10 = pnand %p900_p9, %p897_p8 }
  0x19   :  { %905 = shalt.err (!%p902_p10)
}
  0x1a   :  { %s906_s16 = scalar_lea.vmem %s1006_s21, 1024  ;;  %p911_p12 = scmp.lt.s32.totalorder %s1006_s21, %s1006_s21 }
  0x1b   :  { %p907_p11 = scmp.ne.s32.totalorder %s1006_s21, %s906_s16  ;;  %p912_p13 = scmp.lt.s32.totalorder %s906_s16, %s906_s16 }
  0x1d   :  { %p913_p0 = por %p912_p13, %p911_p12 }
  0x1f   :  { %p914_p1 = pnand %p913_p0, %p907_p11 }
  0x21   :  { %917 = shalt.err (!%p914_p1)
}
  0x22   :  { %24 = dma.hbm_to_vmem [thread:$0]  %s1102_s0, 1024, %s1006_s21, [#allocation4], %s970_s30, %s970_s30, %s971_s6  }
  0x23   :  { %s972_s18 = smov [#allocation8]   ;;  %s918_s23 = scalar_lea.hbm %s1105_s3, 1024 }
  0x24   :  { %s44_s19 = sshll.u32 %s972_s18, 4  ;;  %p919_p2 = scmp.ne.s32.totalorder %s1105_s3, %s918_s23  ;;  %s45_s19 = int_to_ptr.vmem [resolvable:$true] %s44_s19 }
  0x25   :  { %p922_p3 = scmp.lt.u32.totalorder %s918_s23, %s1105_s3 }
  0x27   :  { %p924_p4 = pnand %p922_p3, %p919_p2 }
  0x29   :  { %927 = shalt.err (!%p924_p4)
}
  0x2a   :  { %s928_s28 = scalar_lea.vmem %s45_s19, 1024  ;;  %p933_p6 = scmp.lt.s32.totalorder %s45_s19, %s45_s19 }
  0x2b   :  { %p929_p5 = scmp.ne.s32.totalorder %s45_s19, %s928_s28  ;;  %p934_p7 = scmp.lt.s32.totalorder %s928_s28, %s928_s28 }
  0x2d   :  { %p935_p8 = por %p934_p7, %p933_p6 }
  0x2f   :  { %p936_p9 = pnand %p935_p8, %p929_p5 }
  0x31   :  { %939 = shalt.err (!%p936_p9)
}
  0x32   :  { %50 = dma.hbm_to_vmem [thread:$0]  %s1105_s3, 1024, %s45_s19, [#allocation7], %s970_s30, %s970_s30, %s971_s6  }
  0x33   :  { %962 = dma.done.wait [#allocation4], 1024  }
  0x34   :  { %963 = vsyncadd [#allocation4], 4294966272 }
  0x35   :  { %964 = dma.done.wait [#allocation7], 2048  }
  0x36   :  { %965 = vsyncadd [#allocation7], 4294965248  ;;  %v818_v0 = vld [vmem:[#allocation6] sm:$0xff]   ;;  %v819_v1 = vld [vmem:[#allocation6 + $0x8] sm:$0xff]  }
  0x37   :  { %746 = vmatprep.subr.bf16.mxu0 %v818_v0  ;;  %v820_v2 = vld [vmem:[#allocation6 + $0x10] sm:$0xff]   ;;  %v821_v3 = vld [vmem:[#allocation6 + $0x18] sm:$0xff]   ;;  %v826_v4 = vld [vmem:[#allocation3] sm:$0xff]  }
  0x38   :  { %747 = vmatpush3.bf16.msra.mxu0 %v818_v0  ;;  %762 = vmatprep.mubr.bf16.mxu0 %v826_v4  ;;  %v822_v5 = vld [vmem:[#allocation6 + $0x20] sm:$0xff]   ;;  %v823_v6 = vld [vmem:[#allocation6 + $0x28] sm:$0xff]   ;;  %v824_v9 = vld [vmem:[#allocation6 + $0x30] sm:$0xff]  }
  0x39   :  { %748 = vmatprep.subr.bf16.mxu0 %v819_v1  ;;  %v834_v7 = vld [vmem:[#allocation8] sm:$0xff]   ;;  %v835_v8 = vld [vmem:[#allocation8 + $0x8] sm:$0xff]   ;;  %v825_v10 = vld [vmem:[#allocation6 + $0x38] sm:$0xff]  }
  0x3a   :  { %778 = vmatprep.subr.bf16.mxu1 %v834_v7  ;;  %v827_v11 = vld [vmem:[#allocation3 + $0x8] sm:$0xff]   ;;  %v828_v12 = vld [vmem:[#allocation3 + $0x10] sm:$0xff]   ;;  %v829_v13 = vld [vmem:[#allocation3 + $0x18] sm:$0xff]  }
  0x3b   :  { %779 = vmatpush3.bf16.msra.mxu1 %v834_v7  ;;  %v830_v14 = vld [vmem:[#allocation3 + $0x20] sm:$0xff]   ;;  %v831_v15 = vld [vmem:[#allocation3 + $0x28] sm:$0xff]   ;;  %v832_v16 = vld [vmem:[#allocation3 + $0x30] sm:$0xff]  }
  0x3c   :  { %749 = vmatpush3.bf16.msra.mxu0 %v819_v1  ;;  %780 = vmatprep.subr.bf16.mxu1 %v835_v8  ;;  %v833_v17 = vld [vmem:[#allocation3 + $0x38] sm:$0xff]   ;;  %v836_v18 = vld [vmem:[#allocation8 + $0x10] sm:$0xff]   ;;  %v838_v20 = vld [vmem:[#allocation8 + $0x20] sm:$0xff]  }
  0x3d   :  { %750 = vmatprep.subr.bf16.mxu0 %v820_v2  ;;  %v837_v19 = vld [vmem:[#allocation8 + $0x18] sm:$0xff]   ;;  %v839_v21 = vld [vmem:[#allocation8 + $0x28] sm:$0xff]   ;;  %v840_v22 = vld [vmem:[#allocation8 + $0x30] sm:$0xff]  }
  0x3e   :  { %v841_v23 = vld [vmem:[#allocation8 + $0x38] sm:$0xff]   ;;  %v1061_v24 = vld [vmem:[%s1104_s2] ss:$0 sm:$0xff] }
  0x3f   :  { %781 = vmatpush3.bf16.msra.mxu1 %v835_v8 }
  0x40   :  { %751 = vmatpush3.bf16.msra.mxu0 %v820_v2  ;;  %782 = vmatprep.subr.bf16.mxu1 %v836_v18 }
  0x41   :  { %752 = vmatprep.subr.bf16.mxu0 %v821_v3 }
  0x43   :  { %783 = vmatpush3.bf16.msra.mxu1 %v836_v18 }
  0x44   :  { %753 = vmatpush3.bf16.msra.mxu0 %v821_v3  ;;  %784 = vmatprep.subr.bf16.mxu1 %v837_v19 }
  0x45   :  { %754 = vmatprep.subr.bf16.mxu0 %v822_v5 }
  0x47   :  { %785 = vmatpush3.bf16.msra.mxu1 %v837_v19 }
  0x48   :  { %755 = vmatpush3.bf16.msra.mxu0 %v822_v5  ;;  %786 = vmatprep.subr.bf16.mxu1 %v838_v20 }
  0x49   :  { %756 = vmatprep.subr.bf16.mxu0 %v823_v6 }
  0x4b   :  { %787 = vmatpush3.bf16.msra.mxu1 %v838_v20 }
  0x4c   :  { %757 = vmatpush3.bf16.msra.mxu0 %v823_v6  ;;  %788 = vmatprep.subr.bf16.mxu1 %v839_v21 }
  0x4d   :  { %758 = vmatprep.subr.bf16.mxu0 %v824_v9 }
  0x4f   :  { %789 = vmatpush3.bf16.msra.mxu1 %v839_v21 }
  0x50   :  { %759 = vmatpush3.bf16.msra.mxu0 %v824_v9  ;;  %790 = vmatprep.subr.bf16.mxu1 %v840_v22 }
  0x51   :  { %760 = vmatprep.subr.bf16.mxu0 %v825_v10 }
  0x53   :  { %791 = vmatpush3.bf16.msra.mxu1 %v840_v22 }
  0x54   :  { %761 = vmatpush3.bf16.msra.mxu0 %v825_v10  ;;  %792 = vmatprep.subr.bf16.mxu1 %v841_v23 }
  0x57   :  { %763 = vmatmul.mubr.bf16.vlgmr.msra.gmra.mrb[0].mxu0 %v827_v11  ;;  %793 = vmatpush3.bf16.msra.mxu1 %v841_v23 }
  0x58   :  { %766 = vmatprep.mubr.bf16.mxu0 %v828_v12 }
  0x5f   :  { %767 = vmatmul.mubr.bf16.gmra.mrb[4].mxu0 %v829_v13 }
  0x60   :  { %770 = vmatprep.mubr.bf16.mxu0 %v830_v14 }
  0x67   :  { %771 = vmatmul.mubr.bf16.gmra.mrb[8].mxu0 %v831_v15 }
  0x68   :  { %774 = vmatprep.mubr.bf16.mxu0 %v832_v16 }
  0x6f   :  { %775 = vmatmul.mubr.bf16.gmra.mrb[12].mxu0 %v833_v17 }
 0x12a   :  { %v764_v25 = vpop.f32.mrb[0].mxu0 }
 0x12b   :  { %v261_v26 = vadd.f32 %v764_v25, %v1061_v24  ;;  %v252_v27 = vpop.f32.mrb[1].mxu0 }
 0x12c   :  { %v253_v28 = vadd.f32 %v1061_v24, %v252_v27  ;;  %v765_v29 = vpop.f32.mrb[2].mxu0 }
 0x12d   :  { %v333_v30 = vmul.f32 0.70710677, %v261_v26  ;;  %v264_v31 = vadd.f32 %v765_v29, %v1061_v24  ;;  %v255_v32 = vpop.f32.mrb[3].mxu0  ;;  %v317_v53 = vmul.f32 0.5, %v261_v26 }
 0x12e   :  { %v331_v33 = vmul.f32 0.70710677, %v253_v28  ;;  %v256_v34 = vadd.f32 %v1061_v24, %v255_v32  ;;  %v315_v63 = vmul.f32 0.5, %v253_v28 }
 0x12f   :  { %842 = verf.f32 %v333_v30  ;;  %v334_v35 = vmul.f32 0.70710677, %v264_v31  ;;  %v318_v58 = vmul.f32 0.5, %v264_v31 }
 0x130   :  { %844 = verf.f32 %v331_v33  ;;  %v332_v36 = vmul.f32 0.70710677, %v256_v34  ;;  %v316_v5 = vmul.f32 0.5, %v256_v34 }
 0x131   :  { %846 = verf.f32 %v334_v35 }
 0x132   :  { %848 = verf.f32 %v332_v36  ;;  %v768_v37 = vpop.f32.mrb[4].mxu0 }
 0x133   :  { %v277_v38 = vadd.f32 %v768_v37, %v1061_v24  ;;  %v268_v39 = vpop.f32.mrb[5].mxu0 }
 0x134   :  { %v269_v40 = vadd.f32 %v1061_v24, %v268_v39  ;;  %v769_v41 = vpop.f32.mrb[6].mxu0 }
 0x135   :  { %v337_v42 = vmul.f32 0.70710677, %v277_v38  ;;  %v280_v43 = vadd.f32 %v769_v41, %v1061_v24  ;;  %v271_v44 = vpop.f32.mrb[7].mxu0  ;;  %v321_v25 = vmul.f32 0.5, %v277_v38 }
 0x136   :  { %v335_v45 = vmul.f32 0.70710677, %v269_v40  ;;  %v272_v46 = vadd.f32 %v1061_v24, %v271_v44  ;;  %v319_v30 = vmul.f32 0.5, %v269_v40 }
 0x137   :  { %850 = verf.f32 %v337_v42  ;;  %v338_v47 = vmul.f32 0.70710677, %v280_v43  ;;  %v322_v26 = vmul.f32 0.5, %v280_v43 }
 0x138   :  { %852 = verf.f32 %v335_v45  ;;  %v336_v48 = vmul.f32 0.70710677, %v272_v46  ;;  %v320_v31 = vmul.f32 0.5, %v272_v46 }
 0x139   :  { %v843_v49 = vpop.eup %842  ;;  %854 = verf.f32 %v338_v47 }
 0x13a   :  { %v845_v50 = vpop.eup %844  ;;  %856 = verf.f32 %v336_v48  ;;  %v772_v51 = vpop.f32.mrb[8].mxu0  ;;  %v365_v54 = vadd.f32 1.0, %v843_v49 }
 0x13b   :  { %v847_v52 = vpop.eup %846  ;;  %v1072_v55 = vadd.f32 %v772_v51, %v1061_v24  ;;  %v284_v56 = vpop.f32.mrb[9].mxu0  ;;  %v363_v62 = vadd.f32 1.0, %v845_v50 }
 0x13c   :  { %v849_v57 = vpop.eup %848  ;;  %v366_v59 = vadd.f32 1.0, %v847_v52  ;;  %v1075_v60 = vadd.f32 %v1061_v24, %v284_v56  ;;  %v773_v61 = vpop.f32.mrb[10].mxu0  ;;  %v381_v8 = vmul.f32 %v365_v54, %v317_v53 }
 0x13d   :  { %v341_v0 = vmul.f32 0.70710677, %v1072_v55  ;;  %v296_v1 = vadd.f32 %v773_v61, %v1061_v24  ;;  %v287_v2 = vpop.f32.mrb[11].mxu0  ;;  %v364_v3 = vadd.f32 1.0, %v849_v57  ;;  %v379_v11 = vmul.f32 %v363_v62, %v315_v63 }
 0x13e   :  { %v382_v4 = vmul.f32 %v366_v59, %v318_v58  ;;  %v339_v6 = vmul.f32 0.70710677, %v1075_v60  ;;  %v288_v7 = vadd.f32 %v1061_v24, %v287_v2  ;;  %v325_v52 = vmul.f32 0.5, %v1072_v55 }
 0x13f   :  { %858 = verf.f32 %v341_v0  ;;  %v342_v9 = vmul.f32 0.70710677, %v296_v1  ;;  %v380_v12 = vmul.f32 %v364_v3, %v316_v5  ;;  %v326_v53 = vmul.f32 0.5, %v296_v1 }
 0x140   :  { %860 = verf.f32 %v339_v6  ;;  %v340_v10 = vmul.f32 0.70710677, %v288_v7  ;;  %v412_v14 = vpack.c.bf16 %v382_v4, %v381_v8  ;;  %v324_v56 = vmul.f32 0.5, %v288_v7 }
 0x141   :  { %v851_v13 = vpop.eup %850  ;;  %862 = verf.f32 %v342_v9  ;;  %v411_v18 = vpack.c.bf16 %v380_v12, %v379_v11 }
 0x142   :  { %v853_v15 = vpop.eup %852  ;;  %v369_v16 = vadd.f32 1.0, %v851_v13  ;;  %864 = verf.f32 %v340_v10  ;;  %v776_v17 = vpop.f32.mrb[12].mxu0 }
 0x143   :  { %v855_v19 = vpop.eup %854  ;;  %v367_v20 = vadd.f32 1.0, %v853_v15  ;;  %v309_v21 = vadd.f32 %v776_v17, %v1061_v24  ;;  %v300_v22 = vpop.f32.mrb[13].mxu0  ;;  %794 = vmatprep.mubr.bf16.mxu1 %v411_v18  ;;  %v713_v17 = vld [vmem:[%s1106_s4] ss:$0 sm:$0xff]  ;;  %s973_s4 = smov [#allocation9]  }
 0x144   :  { %v857_v23 = vpop.eup %856  ;;  %v370_v27 = vadd.f32 1.0, %v855_v19  ;;  %v301_v28 = vadd.f32 %v1061_v24, %v300_v22  ;;  %v777_v29 = vpop.f32.mrb[14].mxu0  ;;  %795 = vmatmul.mubr.bf16.vlgmr.msra.gmra.mrb[0].mxu1 %v412_v14  ;;  %v385_v35 = vmul.f32 %v369_v16, %v321_v25  ;;  %s675_s6 = sshll.u32 %s973_s4, 4  ;;  %s676_s6 = int_to_ptr.vmem [resolvable:$true] %s675_s6 }
 0x145   :  { %v368_v32 = vadd.f32 1.0, %v857_v23  ;;  %v345_v33 = vmul.f32 0.70710677, %v309_v21  ;;  %v303_v34 = vpop.f32.mrb[15].mxu0  ;;  %v312_v39 = vadd.f32 %v777_v29, %v1061_v24  ;;  %v383_v41 = vmul.f32 %v367_v20, %v319_v30  ;;  %s940_s7 = scalar_lea.vmem %s676_s6, 2048  ;;  %p945_p11 = scmp.lt.s32.totalorder %s676_s6, %s676_s6 }
 0x146   :  { %v386_v36 = vmul.f32 %v370_v27, %v322_v26  ;;  %v343_v37 = vmul.f32 0.70710677, %v301_v28  ;;  %v304_v38 = vadd.f32 %v1061_v24, %v303_v34  ;;  %v323_v24 = vmul.f32 0.5, %v1075_v60  ;;  %p941_p10 = scmp.ne.s32.totalorder %s676_s6, %s940_s7  ;;  %p946_p12 = scmp.lt.s32.totalorder %s940_s7, %s940_s7 }
 0x147   :  { %v384_v42 = vmul.f32 %v368_v32, %v320_v31  ;;  %866 = verf.f32 %v345_v33  ;;  %v346_v43 = vmul.f32 0.70710677, %v312_v39  ;;  %v329_v1 = vmul.f32 0.5, %v309_v21 }
 0x148   :  { %868 = verf.f32 %v343_v37  ;;  %v414_v44 = vpack.c.bf16 %v386_v36, %v385_v35  ;;  %v344_v40 = vmul.f32 0.70710677, %v304_v38  ;;  %v330_v8 = vmul.f32 0.5, %v312_v39  ;;  %p947_p13 = por %p946_p12, %p945_p11 }
 0x149   :  { %v859_v45 = vpop.eup %858  ;;  %v413_v46 = vpack.c.bf16 %v384_v42, %v383_v41  ;;  %870 = verf.f32 %v346_v43  ;;  %v327_v60 = vmul.f32 0.5, %v301_v28  ;;  %v328_v7 = vmul.f32 0.5, %v304_v38 }
 0x14a   :  { %v861_v47 = vpop.eup %860  ;;  %v373_v48 = vadd.f32 1.0, %v859_v45  ;;  %872 = verf.f32 %v344_v40  ;;  %p948_p0 = pnand %p947_p13, %p941_p10 }
 0x14b   :  { %v863_v49 = vpop.eup %862  ;;  %v371_v50 = vadd.f32 1.0, %v861_v47  ;;  %798 = vmatprep.mubr.bf16.mxu1 %v413_v46 }
 0x14c   :  { %v865_v51 = vpop.eup %864  ;;  %v374_v54 = vadd.f32 1.0, %v863_v49  ;;  %799 = vmatmul.mubr.bf16.gmra.mrb[4].mxu1 %v414_v44  ;;  %v389_v58 = vmul.f32 %v373_v48, %v325_v52 }
 0x14d   :  { %v372_v57 = vadd.f32 1.0, %v865_v51  ;;  %v387_v61 = vmul.f32 %v371_v50, %v323_v24 }
 0x14e   :  { %v390_v59 = vmul.f32 %v374_v54, %v326_v53 }
 0x14f   :  { %v388_v62 = vmul.f32 %v372_v57, %v324_v56 }
 0x150   :  { %v416_v63 = vpack.c.bf16 %v390_v59, %v389_v58 }
 0x151   :  { %v867_v0 = vpop.eup %866  ;;  %v415_v2 = vpack.c.bf16 %v388_v62, %v387_v61 }
 0x152   :  { %v869_v3 = vpop.eup %868  ;;  %v377_v4 = vadd.f32 1.0, %v867_v0 }
 0x153   :  { %802 = vmatprep.mubr.bf16.mxu1 %v415_v2  ;;  %v871_v5 = vpop.eup %870  ;;  %v375_v6 = vadd.f32 1.0, %v869_v3 }
 0x154   :  { %v873_v55 = vpop.eup %872  ;;  %v378_v9 = vadd.f32 1.0, %v871_v5  ;;  %803 = vmatmul.mubr.bf16.gmra.mrb[8].mxu1 %v416_v63  ;;  %v393_v11 = vmul.f32 %v377_v4, %v329_v1 }
 0x155   :  { %v376_v10 = vadd.f32 1.0, %v873_v55  ;;  %v391_v13 = vmul.f32 %v375_v6, %v327_v60 }
 0x156   :  { %v394_v12 = vmul.f32 %v378_v9, %v330_v8 }
 0x157   :  { %v392_v14 = vmul.f32 %v376_v10, %v328_v7 }
 0x158   :  { %v418_v15 = vpack.c.bf16 %v394_v12, %v393_v11 }
 0x159   :  { %v417_v16 = vpack.c.bf16 %v392_v14, %v391_v13 }
 0x15b   :  { %806 = vmatprep.mubr.bf16.mxu1 %v417_v16 }
 0x15c   :  { %807 = vmatmul.mubr.bf16.gmra.mrb[12].mxu1 %v418_v15 }
 0x217   :  { %v796_v18 = vpop.f32.mrb[0].mxu1 }
 0x218   :  { %v640_v19 = vadd.f32 %v796_v18, %v713_v17  ;;  %v517_v20 = vpop.f32.mrb[1].mxu1 }
 0x219   :  { %v638_v21 = vadd.f32 %v713_v17, %v517_v20  ;;  %v797_v22 = vpop.f32.mrb[2].mxu1 }
 0x21a   :  { %656 = vst [vmem:[#allocation9 + $0x10] sm:$0xff] %v640_v19  ;;  %v641_v23 = vadd.f32 %v797_v22, %v713_v17  ;;  %v520_v25 = vpop.f32.mrb[3].mxu1 }
 0x21b   :  { %654 = vst [vmem:[#allocation9] sm:$0xff] %v638_v21  ;;  %v639_v26 = vadd.f32 %v713_v17, %v520_v25 }
 0x21c   :  { %657 = vst [vmem:[#allocation9 + $0x18] sm:$0xff] %v641_v23 }
 0x21d   :  { %655 = vst [vmem:[#allocation9 + $0x8] sm:$0xff] %v639_v26 }
 0x21f   :  { %v800_v27 = vpop.f32.mrb[4].mxu1 }
 0x220   :  { %v644_v28 = vadd.f32 %v800_v27, %v713_v17  ;;  %v533_v29 = vpop.f32.mrb[5].mxu1 }
 0x221   :  { %v642_v30 = vadd.f32 %v713_v17, %v533_v29  ;;  %v801_v31 = vpop.f32.mrb[6].mxu1 }
 0x222   :  { %660 = vst [vmem:[#allocation9 + $0x30] sm:$0xff] %v644_v28  ;;  %v645_v32 = vadd.f32 %v801_v31, %v713_v17  ;;  %v536_v33 = vpop.f32.mrb[7].mxu1 }
 0x223   :  { %658 = vst [vmem:[#allocation9 + $0x20] sm:$0xff] %v642_v30  ;;  %v643_v34 = vadd.f32 %v713_v17, %v536_v33 }
 0x224   :  { %661 = vst [vmem:[#allocation9 + $0x38] sm:$0xff] %v645_v32 }
 0x225   :  { %659 = vst [vmem:[#allocation9 + $0x28] sm:$0xff] %v643_v34 }
 0x227   :  { %v804_v35 = vpop.f32.mrb[8].mxu1 }
 0x228   :  { %v648_v36 = vadd.f32 %v804_v35, %v713_v17  ;;  %v549_v37 = vpop.f32.mrb[9].mxu1 }
 0x229   :  { %v646_v39 = vadd.f32 %v713_v17, %v549_v37  ;;  %v805_v41 = vpop.f32.mrb[10].mxu1 }
 0x22a   :  { %664 = vst [vmem:[#allocation9 + $0x50] sm:$0xff] %v648_v36  ;;  %v649_v42 = vadd.f32 %v805_v41, %v713_v17  ;;  %v552_v38 = vpop.f32.mrb[11].mxu1 }
 0x22b   :  { %662 = vst [vmem:[#allocation9 + $0x40] sm:$0xff] %v646_v39  ;;  %v647_v43 = vadd.f32 %v713_v17, %v552_v38 }
 0x22c   :  { %665 = vst [vmem:[#allocation9 + $0x58] sm:$0xff] %v649_v42 }
 0x22d   :  { %663 = vst [vmem:[#allocation9 + $0x48] sm:$0xff] %v647_v43 }
 0x22f   :  { %v808_v44 = vpop.f32.mrb[12].mxu1 }
 0x230   :  { %v652_v45 = vadd.f32 %v808_v44, %v713_v17  ;;  %v565_v40 = vpop.f32.mrb[13].mxu1 }
 0x231   :  { %v650_v46 = vadd.f32 %v713_v17, %v565_v40  ;;  %v809_v47 = vpop.f32.mrb[14].mxu1 }
 0x232   :  { %668 = vst [vmem:[#allocation9 + $0x70] sm:$0xff] %v652_v45  ;;  %v653_v48 = vadd.f32 %v809_v47, %v713_v17  ;;  %v568_v49 = vpop.f32.mrb[15].mxu1 }
 0x233   :  { %666 = vst [vmem:[#allocation9 + $0x60] sm:$0xff] %v650_v46  ;;  %v651_v50 = vadd.f32 %v713_v17, %v568_v49 }
 0x234   :  { %669 = vst [vmem:[#allocation9 + $0x78] sm:$0xff] %v653_v48 }
 0x235   :  { %667 = vst [vmem:[#allocation9 + $0x68] sm:$0xff] %v651_v50 }
 0x236   :  { %951 = shalt.err (!%p948_p0)
}
 0x237   :  { %s952_s10 = scalar_lea.hbm %s1107_s5, 2048 }
 0x238   :  { %p953_p1 = scmp.ne.s32.totalorder %s1107_s5, %s952_s10  ;;  %p956_p2 = scmp.lt.u32.totalorder %s952_s10, %s1107_s5 }
 0x23a   :  { %p958_p3 = pnand %p956_p2, %p953_p1 }
 0x23c   :  { %961 = shalt.err (!%p958_p3)
}
 0x23d   :  { %s974_s15 = smov 128   ;;  %s975_s16 = smov 8  }
 0x23e   :  { %681 = dma.vmem_to_hbm [thread:$0]  %s676_s6, 2048, %s1107_s5, [#allocation5], %s974_s15, %s974_s15, %s975_s16  }
 0x23f   :  { %966 = dma.done.wait [#allocation5], 2048  }
 0x240   :  { %967 = vsyncadd [#allocation5], 4294965248 }
 0x241   :  { %685 = vsyncpa [#allocation4], 1 }
 0x242   :  { %686 = vsyncpa [#allocation7], 1 }
 0x243   :  { %687 = vsyncpa [#allocation5], 1 }

</bundles_post_ra>
